<compile_context>
chip_gen: v6e
topology: v6e:2x2x1
jax: 0.10.0
libtpu: 0.0.40
codegen_flags: <defaults>
</compile_context>

<pallas_src>
import functools

import jax
import jax.numpy as jnp
from jax import lax
from jax.experimental import pallas as pl
from jax.experimental.pallas import tpu as pltpu


def _pow_modulation(one_minus_p, gamma):
    """(1 - p)**gamma specialized at trace time (gamma is a Python float)."""
    if gamma == 0.0:
        return None
    g = float(gamma)
    if g.is_integer() and 1.0 <= g <= 8.0:
        out = one_minus_p
        for _ in range(int(g) - 1):
            out = out * one_minus_p           # VPU multiplies, no EUP pow
        return out
    return one_minus_p ** g                   # exp(g*log(.)) on the EUP


def _focal_loss_kernel(logits_ref, labels_ref, alpha_ref, out_ref, acc_ref,
                       *, gamma, eps, n_true, tile_n):
    step = pl.program_id(0)

    @pl.when(step == 0)
    def _():
        acc_ref[...] = jnp.zeros_like(acc_ref)

    logits = logits_ref[...].astype(jnp.float32)        # (TN, C)
    labels = labels_ref[...]                            # (TN, 1) int32
    alpha = alpha_ref[...].astype(jnp.float32)          # (1, C)

    tn, c = logits.shape

    # Softmax pieces: the only full-width EUP op is this exp.
    m = jnp.max(logits, axis=-1, keepdims=True)          # (TN, 1)
    e = jnp.exp(logits - m)                              # (TN, C)
    denom = jnp.sum(e, axis=-1, keepdims=True)           # (TN, 1)

    # One-hot gather of the label column via mask + reduce.
    col = lax.broadcasted_iota(jnp.int32, (tn, c), 1)
    y = (col == labels).astype(jnp.float32)              # (TN, C)
    e_t = jnp.sum(e * y, axis=-1, keepdims=True)          # (TN, 1)
    alpha_t = jnp.sum(alpha * y, axis=-1, keepdims=True)  # (TN, 1)  == alpha[labels]

    # Per-row (TN, 1) tail: clamp in probability space, then log / modulation.
    p_t = e_t / denom
    p_t = jnp.clip(p_t, eps, 1.0 - eps)
    loss_row = -alpha_t * jnp.log(p_t)                    # (TN, 1)
    mod = _pow_modulation(1.0 - p_t, gamma)
    if mod is not None:
        loss_row = loss_row * mod

    # Mask rows of a ragged last tile (OOB block rows contain garbage).
    row_ids = step * tile_n + lax.broadcasted_iota(jnp.int32, (tn, 1), 0)
    loss_row = jnp.where(row_ids < n_true, loss_row, 0.0)

    acc_ref[...] += jnp.sum(loss_row, keepdims=True)      # (1, 1)

    @pl.when(step == pl.num_programs(0) - 1)
    def _():
        out_ref[...] = (acc_ref[...] * (1.0 / n_true)).astype(out_ref.dtype)


def _choose_tile_n(n, c, itemsize):
    """Batch-tile rows: big enough to amortize per-step overhead, small enough
    that the double-buffered logits block stays well inside the scoped-VMEM
    defaults of every generation (v7x has only 64 MiB physical)."""
    if n <= 8:
        return n
    budget_bytes = 4 * 1024 * 1024                       # per logits buffer (x2 double-buffered)
    tn = budget_bytes // max(1, c * itemsize)
    tn = max(8, min(1024, (tn // 8) * 8))                # multiple of 8, <= 1024 rows
    n_pad8 = pl.cdiv(n, 8) * 8
    return min(tn, n_pad8)


def focal_loss(logits, labels, alpha, gamma=0.0, eps=1e-7, tile_n=None):
    """logits: (N, C) float (f32 or bf16), labels: (N,) int, alpha: (C,) float.
    Returns scalar mean focal loss, matching the PyTorch module."""
    n, c = logits.shape
    labels2d = labels.astype(jnp.int32).reshape(n, 1)
    alpha2d = jnp.asarray(alpha, dtype=jnp.float32).reshape(1, c)

    if tile_n is None:
        tile_n = _choose_tile_n(n, c, logits.dtype.itemsize)
    tile_n = int(tile_n)
    grid_n = pl.cdiv(n, tile_n)

    kernel = functools.partial(
        _focal_loss_kernel,
        gamma=float(gamma), eps=float(eps), n_true=int(n), tile_n=tile_n)

    out = pl.pallas_call(
        kernel,
        out_shape=jax.ShapeDtypeStruct((1, 1), jnp.float32),
        grid_spec=pltpu.PrefetchScalarGridSpec(
            num_scalar_prefetch=0,
            grid=(grid_n,),
            in_specs=[
                pl.BlockSpec((tile_n, c), lambda i: (i, 0)),   # logits tile
                pl.BlockSpec((tile_n, 1), lambda i: (i, 0)),   # labels column tile
                pl.BlockSpec((1, c), lambda i: (0, 0)),        # alpha, resident
            ],
            out_specs=pl.BlockSpec((1, 1), lambda i: (0, 0)),  # resident scalar output
            scratch_shapes=[pltpu.VMEM((1, 1), jnp.float32)],  # running sum
        ),
        compiler_params=pltpu.CompilerParams(
            dimension_semantics=("arbitrary",)),               # reduction axis
    )(logits, labels2d, alpha2d)
    return out[0, 0]


def focal_loss_ref(logits, labels, alpha, gamma=0.0, eps=1e-7):
    """Pure-JAX reference mirroring the PyTorch module exactly."""
    c = logits.shape[-1]
    y = jnp.eye(c, dtype=jnp.float32)[labels]
    probs = jax.nn.softmax(logits.astype(jnp.float32), axis=-1)
    probs = jnp.clip(probs, eps, 1.0 - eps)
    alphas = jnp.asarray(alpha, jnp.float32)[labels][:, None]
    loss = -1.0 * alphas * y * jnp.log(probs)
    loss = loss * (1.0 - probs) ** gamma
    return loss.sum(axis=1).mean()


if __name__ == "__main__":
    # Small shapes; N=200 with tile_n=64 gives a 4-step grid with a ragged
    # last tile, exercising accumulation + row masking.
    N, C = 200, 32
    gamma = 2.0
    eps = 1e-7

    key = jax.random.PRNGKey(0)
    k1, k2, k3 = jax.random.split(key, 3)

    logits = jax.random.normal(k1, (N, C), dtype=jnp.float32) * 2.0
    labels = jax.random.randint(k2, (N,), 0, C, dtype=jnp.int32)
    alpha = jax.random.uniform(k3, (C,), dtype=jnp.float32, minval=0.25, maxval=1.0)

    out = focal_loss(logits, labels, alpha, gamma=gamma, eps=eps, tile_n=64)
    out = jax.block_until_ready(out)
    ref = focal_loss_ref(logits, labels, alpha, gamma=gamma, eps=eps)
    assert jnp.allclose(out, ref, rtol=1e-5, atol=1e-6), (out, ref)

    # gamma=0 (modulation skipped) and non-integer gamma (pow path).
    for g in (0.0, 0.5):
        o = jax.block_until_ready(
            focal_loss(logits, labels, alpha, gamma=g, eps=eps, tile_n=64))
        r = focal_loss_ref(logits, labels, alpha, gamma=g, eps=eps)
        assert jnp.allclose(o, r, rtol=1e-5, atol=1e-6), (g, o, r)

    print("KERNEL_OK")
</pallas_src>

<mosaic_0001>
module attributes {stable_mosaic.version = 11 : i64} {
  func.func @_focal_loss_kernel(%arg0: i32, %arg1: memref<64x32xf32, #tpu.memory_space<vmem>>, %arg2: memref<64x1xi32, #tpu.memory_space<vmem>>, %arg3: memref<1x32xf32, #tpu.memory_space<vmem>>, %arg4: memref<1x1xf32, #tpu.memory_space<vmem>>, %arg5: memref<1x1xf32, #tpu.memory_space<vmem>>) attributes {dimension_semantics = [#tpu.dimension_semantics<arbitrary>], iteration_bounds = array<i64: 4>, scalar_prefetch = 0 : i64, scratch_operands = 1 : i64, tpu.core_type = #tpu.core_type<tc>, window_params = [{transform_indices = @transform_0, window_bounds = array<i64: 64, 32>}, {transform_indices = @transform_1, window_bounds = array<i64: 64, 1>}, {pipeline_mode = #tpu.pipeline_mode<synchronous>, transform_indices = @transform_2, window_bounds = array<i64: 1, 32>}, {pipeline_mode = #tpu.pipeline_mode<synchronous>, transform_indices = @transform_3, window_bounds = array<i64: 1, 1>}]} {
    %c0_i32 = arith.constant 0 : i32
    %0 = arith.cmpi eq, %arg0, %c0_i32 : i32
    %1 = arith.extui %0 : i1 to i32
    %c0_i32_0 = arith.constant 0 : i32
    %2 = arith.cmpi ne, %1, %c0_i32_0 : i32
    scf.if %2 {
      %cst_20 = arith.constant 0.000000e+00 : f32
      %57 = vector.broadcast %cst_20 : f32 to vector<1x1xf32>
      %c0_21 = arith.constant 0 : index
      %c0_22 = arith.constant 0 : index
      %58 = vector.load %arg5[%c0_21, %c0_22] : memref<1x1xf32, #tpu.memory_space<vmem>>, vector<1x1xf32>
      tpu.vector_store %arg5[%c0_21, %c0_22], %57 {strides = array<i32>} : memref<1x1xf32, #tpu.memory_space<vmem>>, vector<1x1xf32>,
    } else {
    }
    %c0 = arith.constant 0 : index
    %c0_1 = arith.constant 0 : index
    %3 = vector.load %arg1[%c0, %c0_1] : memref<64x32xf32, #tpu.memory_space<vmem>>, vector<64x32xf32>
    %c0_2 = arith.constant 0 : index
    %c0_3 = arith.constant 0 : index
    %4 = vector.load %arg2[%c0_2, %c0_3] : memref<64x1xi32, #tpu.memory_space<vmem>>, vector<64x1xi32>
    %c0_4 = arith.constant 0 : index
    %c0_5 = arith.constant 0 : index
    %5 = vector.load %arg3[%c0_4, %c0_5] : memref<1x32xf32, #tpu.memory_space<vmem>>, vector<1x32xf32>
    %cst = arith.constant dense<0xFF800000> : vector<64xf32>
    %6 = vector.multi_reduction <maximumf>, %3, %cst [1] : vector<64x32xf32> to vector<64xf32>
    %7 = vector.shape_cast %6 : vector<64xf32> to vector<64x1xf32>
    %8 = vector.broadcast %7 : vector<64x1xf32> to vector<64x32xf32>
    %9 = arith.subf %3, %8 : vector<64x32xf32>
    %10 = math.exp %9 : vector<64x32xf32>
    %cst_6 = arith.constant dense<0.000000e+00> : vector<64xf32>
    %11 = vector.multi_reduction <add>, %10, %cst_6 [1] : vector<64x32xf32> to vector<64xf32>
    %12 = vector.shape_cast %11 : vector<64xf32> to vector<64x1xf32>
    %13 = tpu.iota {dimensions = array<i32: 1>} : vector<64x32xi32>
    %14 = vector.broadcast %4 : vector<64x1xi32> to vector<64x32xi32>
    %15 = arith.cmpi eq, %13, %14 : vector<64x32xi32>
    %16 = arith.extui %15 : vector<64x32xi1> to vector<64x32xi32>
    %17 = arith.sitofp %16 : vector<64x32xi32> to vector<64x32xf32>
    %18 = arith.mulf %10, %17 : vector<64x32xf32>
    %cst_7 = arith.constant dense<0.000000e+00> : vector<64xf32>
    %19 = vector.multi_reduction <add>, %18, %cst_7 [1] : vector<64x32xf32> to vector<64xf32>
    %20 = vector.shape_cast %19 : vector<64xf32> to vector<64x1xf32>
    %21 = vector.broadcast %5 : vector<1x32xf32> to vector<64x32xf32>
    %22 = arith.mulf %21, %17 : vector<64x32xf32>
    %cst_8 = arith.constant dense<0.000000e+00> : vector<64xf32>
    %23 = vector.multi_reduction <add>, %22, %cst_8 [1] : vector<64x32xf32> to vector<64xf32>
    %24 = vector.shape_cast %23 : vector<64xf32> to vector<64x1xf32>
    %25 = arith.divf %20, %12 : vector<64x1xf32>
    %cst_9 = arith.constant 1.000000e-07 : f32
    %cst_10 = arith.constant 0.99999988 : f32
    %26 = vector.broadcast %cst_9 : f32 to vector<64x1xf32>
    %27 = arith.maximumf %26, %25 : vector<64x1xf32>
    %28 = vector.broadcast %cst_10 : f32 to vector<64x1xf32>
    %29 = arith.minimumf %28, %27 : vector<64x1xf32>
    %cst_11 = arith.constant 0.000000e+00 : f32
    %30 = vector.broadcast %cst_11 : f32 to vector<64x1xf32>
    %31 = arith.subf %30, %24 : vector<64x1xf32>
    %32 = math.log %29 : vector<64x1xf32>
    %33 = arith.mulf %31, %32 : vector<64x1xf32>
    %cst_12 = arith.constant 1.000000e+00 : f32
    %34 = vector.broadcast %cst_12 : f32 to vector<64x1xf32>
    %35 = arith.subf %34, %29 : vector<64x1xf32>
    %36 = arith.mulf %35, %35 : vector<64x1xf32>
    %37 = arith.mulf %33, %36 : vector<64x1xf32>
    %c64_i32 = arith.constant 64 : i32
    %38 = arith.muli %arg0, %c64_i32 : i32
    %39 = tpu.iota {dimensions = array<i32: 0>} : vector<64x1xi32>
    %40 = vector.broadcast %38 : i32 to vector<64x1xi32>
    %41 = arith.addi %40, %39 : vector<64x1xi32>
    %c200_i32 = arith.constant 200 : i32
    %42 = vector.broadcast %c200_i32 : i32 to vector<64x1xi32>
    %43 = arith.cmpi slt, %41, %42 : vector<64x1xi32>
    %cst_13 = arith.constant 0.000000e+00 : f32
    %44 = vector.broadcast %cst_13 : f32 to vector<64x1xf32>
    %45 = arith.select %43, %37, %44 : vector<64x1xi1>, vector<64x1xf32>
    %c0_14 = arith.constant 0 : index
    %c0_15 = arith.constant 0 : index
    %46 = vector.load %arg5[%c0_14, %c0_15] : memref<1x1xf32, #tpu.memory_space<vmem>>, vector<1x1xf32>
    %47 = vector.shape_cast %45 : vector<64x1xf32> to vector<1x64x1xf32>
    %cst_16 = arith.constant dense<0.000000e+00> : vector<1xf32>
    %48 = vector.multi_reduction <add>, %47, %cst_16 [1, 2] : vector<1x64x1xf32> to vector<1xf32>
    %49 = vector.shape_cast %48 : vector<1xf32> to vector<1x1x1xf32>
    %50 = vector.extract %49[0, 0, 0] : f32 from vector<1x1x1xf32>
    %51 = vector.broadcast %50 : f32 to vector<1x1xf32>
    %52 = arith.addf %46, %51 : vector<1x1xf32>
    %c0_17 = arith.constant 0 : index
    %c0_18 = arith.constant 0 : index
    %53 = vector.load %arg5[%c0_17, %c0_18] : memref<1x1xf32, #tpu.memory_space<vmem>>, vector<1x1xf32>
    tpu.vector_store %arg5[%c0_17, %c0_18], %52 {strides = array<i32>} : memref<1x1xf32, #tpu.memory_space<vmem>>, vector<1x1xf32>,
    %c3_i32 = arith.constant 3 : i32
    %54 = arith.cmpi eq, %arg0, %c3_i32 : i32
    %55 = arith.extui %54 : i1 to i32
    %c0_i32_19 = arith.constant 0 : i32
    %56 = arith.cmpi ne, %55, %c0_i32_19 : i32
    scf.if %56 {
      %c0_20 = arith.constant 0 : index
      %c0_21 = arith.constant 0 : index
      %57 = vector.load %arg5[%c0_20, %c0_21] : memref<1x1xf32, #tpu.memory_space<vmem>>, vector<1x1xf32>
      %cst_22 = arith.constant 5.000000e-03 : f32
      %58 = vector.broadcast %cst_22 : f32 to vector<1x1xf32>
      %59 = arith.mulf %57, %58 : vector<1x1xf32>
      %c0_23 = arith.constant 0 : index
      %c0_24 = arith.constant 0 : index
      %60 = vector.load %arg4[%c0_23, %c0_24] : memref<1x1xf32, #tpu.memory_space<vmem>>, vector<1x1xf32>
      tpu.vector_store %arg4[%c0_23, %c0_24], %59 {strides = array<i32>} : memref<1x1xf32, #tpu.memory_space<vmem>>, vector<1x1xf32>,
    } else {
    }
    return
  }
  func.func @transform_0(%arg0: i32) -> (i32, i32) {
    %c0_i32 = arith.constant 0 : i32
    %c0_i32_0 = arith.constant 0 : i32
    return %arg0, %c0_i32 : i32, i32
  }
  func.func @transform_1(%arg0: i32) -> (i32, i32) {
    %c0_i32 = arith.constant 0 : i32
    %c0_i32_0 = arith.constant 0 : i32
    return %arg0, %c0_i32 : i32, i32
  }
  func.func @transform_2(%arg0: i32) -> (i32, i32) {
    %c0_i32 = arith.constant 0 : i32
    %c0_i32_0 = arith.constant 0 : i32
    %c0_i32_1 = arith.constant 0 : i32
    return %c0_i32, %c0_i32_0 : i32, i32
  }
  func.func @transform_3(%arg0: i32) -> (i32, i32) {
    %c0_i32 = arith.constant 0 : i32
    %c0_i32_0 = arith.constant 0 : i32
    %c0_i32_1 = arith.constant 0 : i32
    return %c0_i32, %c0_i32_0 : i32, i32
  }
}

</mosaic_0001>

<bundles_post_ra>
// kernel: tpu_custom_call.1
= control target key start
LH: loop header
LB: loop body
LE: loop exit
PB: predicated region body
PF: predicated region fallthrough
CT: control target
= control target key end

     0   :  { %8 = vsyncpa [#allocation4], 0  ;;  %s809_s12 = smov 0   ;;  %s972_s0 = inlined_call_operand.vmem [shape: f32[200,32], index: 0, kind: input, shape index: {}]   ;;  %s973_s1 = inlined_call_operand.vmem [shape: s32[200,1], index: 1, kind: input, shape index: {}]   ;;  %s974_s2 = inlined_call_operand.vmem [shape: f32[1,32], index: 2, kind: input, shape index: {}]   ;;  %s975_s3 = inlined_call_operand.hbm [shape: f32[1,1], index: 3, kind: output, shape index: {}]  }
   0x1 LB: > { %s815_s13 = sadd.s32 4294967295, %s783_s12   ;;  %p658_p0 = scmp.ge.s32.totalorder %s783_s12, 1  ;;  %s783_s12 = sphi %s809_s12, %s14_s12  }
   0x2   : > { %p161_p1 = scmp.lt.s32.totalorder %s783_s12, 5 }
   0x4   : > { %p162_p2 = pnand %p658_p0, %p161_p1 }
   0x5   : > { %s659_s14 = sshll.u32 (!%p162_p2), %s815_s13, 3  ;;  %p663_p4 = scmp.ne.s32.totalorder (!%p162_p2), %s815_s13, 0 }
   0x6   : > { %165 = sbr.rel (%p162_p2) target bundleno = 609 (0x261), region = 32  ;;  %p198_p3 = scmp.lt.s32.totalorder (!%p162_p2), %s659_s14, 24 }
   0xb   : > { %s977_s14 = smov (!%p198_p3, %s659_s14), 24  ;;  %224 = sbr.rel (%p663_p4) target bundleno = 18 (0x12), region = 36 }
   0xc   : > { %s660_s15 = sshll.u32 %s977_s14, 3 }
   0xd   : > { %s201_s18 = scalar_lea.vmem %s972_s0, %s660_s15  ;;  %s826_s21 = scalar_lea.vmem %s973_s1, %s660_s15 }
  0x10   : > { %vm225_vm0 = vcmask 0   ;;  %v785_v0 = vmov 0.0  }
  0x11   : > { %226 = vst.msk [vmem:[#allocation2] sm:$0x1] %vm225_vm0, %v785_v0 }
  0x12 PF: > { %v229_v1 = vld [vmem:[%s201_s18 + $0x10] sm:$0xff]  ;;  %vm244_vm1 = vcmask 261120   ;;  %v227_v2 = vld [vmem:[%s201_s18] sm:$0xff]  ;;  %v230_v3 = vld [vmem:[%s201_s18 + $0x18] sm:$0xff]  ;;  %v786_v7 = vmov 0   ;;  %v317_v51 = vlaneseq  ;;  %s673_s24 = sshll.u32 %s815_s13, 6 }
  0x13   : > { %v251_v4 = vsel %vm244_vm1, %v229_v1, -inf  ;;  %v245_v5 = vsel %vm244_vm1, %v227_v2, -inf  ;;  %v228_v6 = vld [vmem:[%s201_s18 + $0x8] sm:$0xff]  ;;  %700 = vset.pattern.permute.xlu1 %v786_v7  ;;  %699 = vset.pattern.permute.xlu0 %v786_v7  ;;  %v254_v8 = vsel %vm244_vm1, %v230_v3, -inf  ;;  %v231_v11 = vld [vmem:[%s201_s18 + $0x20] sm:$0xff]  ;;  %v234_v14 = vld [vmem:[%s201_s18 + $0x38] sm:$0xff] }
  0x14   : > { %252 = vmax.xlane.f32.xlu1 %v251_v4  ;;  %246 = vmax.xlane.f32.xlu0 %v245_v5  ;;  %v248_v9 = vsel %vm244_vm1, %v228_v6, -inf  ;;  %v232_v10 = vld [vmem:[%s201_s18 + $0x28] sm:$0xff]  ;;  %v257_v13 = vsel %vm244_vm1, %v231_v11, -inf  ;;  %v233_v15 = vld [vmem:[%s201_s18 + $0x30] sm:$0xff]  ;;  %v266_v16 = vsel %vm244_vm1, %v234_v14, -inf  ;;  %v235_v20 = vld [vmem:[%s826_s21] sm:$0xff] }
  0x15   : > { %v260_v12 = vsel %vm244_vm1, %v232_v10, -inf  ;;  %v263_v17 = vsel %vm244_vm1, %v233_v15, -inf  ;;  %v236_v18 = vld [vmem:[%s826_s21 + $0x8] sm:$0xff]  ;;  %v237_v19 = vld [vmem:[%s826_s21 + $0x10] sm:$0xff]  ;;  %v238_v21 = vld [vmem:[%s826_s21 + $0x18] sm:$0xff]  ;;  %v318_v56 = vand.u32 127, %v317_v51 }
  0x16   : > { %v239_v22 = vld [vmem:[%s826_s21 + $0x20] sm:$0xff]  ;;  %v240_v23 = vld [vmem:[%s826_s21 + $0x28] sm:$0xff]  ;;  %v241_v24 = vld [vmem:[%s826_s21 + $0x30] sm:$0xff]  ;;  %v787_v4 = vmov 0.0   ;;  %vm561_vm12 = vcmask 7168   ;;  %p674_p5 = scmp.ne.s32.totalorder %s815_s13, 3 }
  0x17   : > { %v242_v25 = vld [vmem:[%s826_s21 + $0x38] sm:$0xff] }
  0x18   : > { %255 = vmax.xlane.f32.xlu1 %v254_v8  ;;  %249 = vmax.xlane.f32.xlu0 %v248_v9 }
  0x1c   : > { %261 = vmax.xlane.f32.xlu1 %v260_v12  ;;  %258 = vmax.xlane.f32.xlu0 %v257_v13 }
  0x20   : > { %267 = vmax.xlane.f32.xlu1 %v266_v16  ;;  %264 = vmax.xlane.f32.xlu0 %v263_v17 }
  0x31   : > { %323 = vperm.xlu1 %700, %v236_v18  }
  0x35   : > { %326 = vperm.xlu1 %700, %v237_v19  }
  0x36   : > { %320 = vperm.xlu0 %699, %v235_v20  }
  0x39   : > { %329 = vperm.xlu1 %700, %v238_v21  }
  0x3d   : > { %332 = vperm.xlu1 %700, %v239_v22  }
  0x41   : > { %335 = vperm.xlu1 %700, %v240_v23  }
  0x45   : > { %338 = vperm.xlu1 %700, %v241_v24  }
  0x49   : > { %341 = vperm.xlu1 %700, %v242_v25  }
  0x9d   : > { %v253_v26 = vpop.xlane.xlu1 %252  ;;  %v247_v27 = vpop.xlane.xlu0 %246 }
  0x9e   : > { %v269_v28 = vsub.f32 %v227_v2, %v247_v27  ;;  %v271_v30 = vsub.f32 %v229_v1, %v253_v26 }
  0xa0   : > { %v277_v29 = vmul.f32 1.442695, %v269_v28  ;;  %v281_v37 = vmul.f32 1.442695, %v271_v30 }
  0xa1   : > { %v256_v31 = vpop.xlane.xlu1 %255  ;;  %v250_v32 = vpop.xlane.xlu0 %249 }
  0xa2   : > { %v272_v33 = vsub.f32 %v230_v3, %v256_v31  ;;  %v270_v34 = vsub.f32 %v228_v6, %v250_v32  ;;  %701 = vpow2.f32 %v277_v29 }
  0xa4   : > { %v283_v35 = vmul.f32 1.442695, %v272_v33  ;;  %v279_v36 = vmul.f32 1.442695, %v270_v34  ;;  %v672_v33 = vld [vmem:[%s974_s2] ss:$0 sm:$0xff] }
  0xa5   : > { %v262_v38 = vpop.xlane.xlu1 %261  ;;  %v259_v39 = vpop.xlane.xlu0 %258 }
  0xa6   : > { %703 = vpow2.f32 %v283_v35  ;;  %v274_v40 = vsub.f32 %v232_v10, %v262_v38  ;;  %v273_v41 = vsub.f32 %v231_v11, %v259_v39 }
  0xa7   : > { %705 = vpow2.f32 %v279_v36 }
  0xa8   : > { %v287_v42 = vmul.f32 1.442695, %v274_v40  ;;  %v285_v43 = vmul.f32 1.442695, %v273_v41  ;;  %707 = vpow2.f32 %v281_v37 }
  0xa9   : > { %v268_v44 = vpop.xlane.xlu1 %267  ;;  %v265_v45 = vpop.xlane.xlu0 %264 }
  0xaa   : > { %709 = vpow2.f32 %v287_v42  ;;  %v276_v46 = vsub.f32 %v234_v14, %v268_v44  ;;  %v275_v47 = vsub.f32 %v233_v15, %v265_v45 }
  0xab   : > { %711 = vpow2.f32 %v285_v43 }
  0xac   : > { %v291_v48 = vmul.f32 1.442695, %v276_v46  ;;  %v289_v49 = vmul.f32 1.442695, %v275_v47 }
  0xad   : > { %v324_v50 = vpop.permute.xlu1 %323 }
  0xae   : > { %713 = vpow2.f32 %v291_v48  ;;  %vm344_vm2 = vcmp.eq.s32.totalorder %v318_v56, %v324_v50 }
  0xaf   : > { %715 = vpow2.f32 %v289_v49  ;;  %v702_v52 = vpop.eup %701  ;;  %v665_v5 = vsel %vm344_vm2, 1.0, %v787_v4 }
  0xb0   : > { %v293_v54 = vsel %vm244_vm1, %v702_v52, 0.0  ;;  %v406_v36 = vmul.f32 %v672_v33, %v665_v5 }
  0xb1   : > { %v327_v53 = vpop.permute.xlu1 %326  ;;  %294 = vadd.xlane.f32.xlu1 %v293_v54  ;;  %v321_v0 = vpop.permute.xlu0 %320 }
  0xb2   : > { %vm343_vm3 = vcmp.eq.s32.totalorder %v318_v56, %v321_v0  ;;  %vm345_vm5 = vcmp.eq.s32.totalorder %v318_v56, %v327_v53  ;;  %v416_v38 = vsel %vm244_vm1, %v406_v36, 0.0 }
  0xb3   : > { %v704_v55 = vpop.eup %703  ;;  %v664_v12 = vsel %vm343_vm3, 1.0, %v787_v4  ;;  %v666_v19 = vsel %vm345_vm5, 1.0, %v787_v4  ;;  %vm588_vm3 = vcmask 0  }
  0xb4   : > { %v706_v57 = vpop.eup %705  ;;  %v302_v58 = vsel %vm244_vm1, %v704_v55, 0.0  ;;  %v367_v18 = vmul.f32 %v702_v52, %v664_v12  ;;  %v405_v41 = vmul.f32 %v672_v33, %v664_v12  ;;  %v407_v45 = vmul.f32 %v672_v33, %v666_v19 }
  0xb5   : > { %v330_v59 = vpop.permute.xlu1 %329  ;;  %v296_v60 = vsel %vm244_vm1, %v706_v57, 0.0  ;;  %v708_v61 = vpop.eup %707  ;;  %303 = vadd.xlane.f32.xlu1 %v302_v58  ;;  %v368_v11 = vmul.f32 %v706_v57, %v665_v5 }
  0xb6   : > { %297 = vadd.xlane.f32.xlu0 %v296_v60  ;;  %v299_v3 = vsel %vm244_vm1, %v708_v61, 0.0  ;;  %vm346_vm4 = vcmp.eq.s32.totalorder %v318_v56, %v330_v59  ;;  %v375_v23 = vsel %vm244_vm1, %v367_v18, 0.0  ;;  %v369_v25 = vmul.f32 %v708_v61, %v666_v19 }
  0xb7   : > { %v710_v62 = vpop.eup %709  ;;  %v667_v13 = vsel %vm346_vm4, 1.0, %v787_v4  ;;  %v378_v16 = vsel %vm244_vm1, %v368_v11, 0.0  ;;  %v413_v43 = vsel %vm244_vm1, %v405_v41, 0.0  ;;  %v419_v47 = vsel %vm244_vm1, %v407_v45, 0.0 }
  0xb8   : > { %v712_v63 = vpop.eup %711  ;;  %v308_v1 = vsel %vm244_vm1, %v710_v62, 0.0  ;;  %v370_v17 = vmul.f32 %v704_v55, %v667_v13  ;;  %v381_v29 = vsel %vm244_vm1, %v369_v25, 0.0  ;;  %v408_v40 = vmul.f32 %v672_v33, %v667_v13 }
  0xb9   : > { %v333_v2 = vpop.permute.xlu1 %332  ;;  %309 = vadd.xlane.f32.xlu1 %v308_v1  ;;  %v305_v7 = vsel %vm244_vm1, %v712_v63, 0.0 }
  0xba   : > { %300 = vadd.xlane.f32.xlu0 %v299_v3  ;;  %vm347_vm7 = vcmp.eq.s32.totalorder %v318_v56, %v333_v2  ;;  %v384_v22 = vsel %vm244_vm1, %v370_v17, 0.0  ;;  %v422_v42 = vsel %vm244_vm1, %v408_v40, 0.0 }
  0xbb   : > { %v714_v6 = vpop.eup %713  ;;  %v668_v26 = vsel %vm347_vm7, 1.0, %v787_v4 }
  0xbc   : > { %v716_v8 = vpop.eup %715  ;;  %v314_v9 = vsel %vm244_vm1, %v714_v6, 0.0  ;;  %v371_v31 = vmul.f32 %v712_v63, %v668_v26  ;;  %v409_v49 = vmul.f32 %v672_v33, %v668_v26 }
  0xbd   : > { %v336_v10 = vpop.permute.xlu1 %335  ;;  %315 = vadd.xlane.f32.xlu1 %v314_v9  ;;  %v311_v14 = vsel %vm244_vm1, %v716_v8, 0.0 }
  0xbe   : > { %306 = vadd.xlane.f32.xlu0 %v305_v7  ;;  %vm348_vm6 = vcmp.eq.s32.totalorder %v318_v56, %v336_v10  ;;  %v387_v35 = vsel %vm244_vm1, %v371_v31, 0.0  ;;  %v425_v52 = vsel %vm244_vm1, %v409_v49, 0.0 }
  0xbf   : > { %v669_v20 = vsel %vm348_vm6, 1.0, %v787_v4 }
  0xc0   : > { %v372_v24 = vmul.f32 %v710_v62, %v669_v20  ;;  %v410_v44 = vmul.f32 %v672_v33, %v669_v20 }
  0xc1   : > { %v339_v15 = vpop.permute.xlu1 %338  ;;  %379 = vadd.xlane.f32.xlu1 %v378_v16 }
  0xc2   : > { %312 = vadd.xlane.f32.xlu0 %v311_v14  ;;  %vm349_vm9 = vcmp.eq.s32.totalorder %v318_v56, %v339_v15  ;;  %v390_v28 = vsel %vm244_vm1, %v372_v24, 0.0  ;;  %v428_v46 = vsel %vm244_vm1, %v410_v44, 0.0 }
  0xc3   : > { %v670_v32 = vsel %vm349_vm9, 1.0, %v787_v4 }
  0xc4   : > { %v373_v37 = vmul.f32 %v716_v8, %v670_v32  ;;  %v411_v53 = vmul.f32 %v672_v33, %v670_v32 }
  0xc5   : > { %v342_v21 = vpop.permute.xlu1 %341  ;;  %385 = vadd.xlane.f32.xlu1 %v384_v22 }
  0xc6   : > { %vm350_vm8 = vcmp.eq.s32.totalorder %v318_v56, %v342_v21  ;;  %376 = vadd.xlane.f32.xlu0 %v375_v23  ;;  %v393_v39 = vsel %vm244_vm1, %v373_v37, 0.0  ;;  %v431_v54 = vsel %vm244_vm1, %v411_v53, 0.0  ;;  %v881_v21 = vshrl.u32 %v317_v51, 7 }
  0xc7   : > { %v671_v27 = vsel %vm350_vm8, 1.0, %v787_v4 }
  0xc8   : > { %v374_v30 = vmul.f32 %v714_v6, %v671_v27  ;;  %v412_v48 = vmul.f32 %v672_v33, %v671_v27  ;;  %v528_v31 = vadd.s32 8, %v881_v21  ;;  %v530_v37 = vadd.s32 24, %v881_v21 }
  0xc9   : > { %391 = vadd.xlane.f32.xlu1 %v390_v28  ;;  %v529_v40 = vadd.s32 16, %v881_v21 }
  0xca   : > { %382 = vadd.xlane.f32.xlu0 %v381_v29  ;;  %v396_v34 = vsel %vm244_vm1, %v374_v30, 0.0  ;;  %v434_v50 = vsel %vm244_vm1, %v412_v48, 0.0  ;;  %v532_v48 = vadd.s32 40, %v881_v21 }
  0xcd   : > { %397 = vadd.xlane.f32.xlu1 %v396_v34  ;;  %v893_v34 = vstv %s673_s24 }
  0xce   : > { %388 = vadd.xlane.f32.xlu0 %v387_v35  ;;  %v536_v44 = vadd.s32 %v893_v34, %v881_v21  ;;  %v909_v45 = vadd.s32 %v893_v34, %v530_v37 }
  0xd0   : > { %vm544_vm11 = vcmp.lt.s32.totalorder %v536_v44, 200  ;;  %vm547_vm13 = vcmp.lt.s32.totalorder %v909_v45, 200 }
  0xd1   : > { %417 = vadd.xlane.f32.xlu1 %v416_v38 }
  0xd2   : > { %394 = vadd.xlane.f32.xlu0 %v393_v39 }
  0xd5   : > { %423 = vadd.xlane.f32.xlu1 %v422_v42  ;;  %v903_v42 = vadd.s32 %v893_v34, %v528_v31 }
  0xd6   : > { %414 = vadd.xlane.f32.xlu0 %v413_v43 }
  0xd7   : > { %vm545_vm10 = vcmp.lt.s32.totalorder %v903_v42, 200 }
  0xd9   : > { %429 = vadd.xlane.f32.xlu1 %v428_v46 }
  0xda   : > { %420 = vadd.xlane.f32.xlu0 %v419_v47 }
  0xdd   : > { %435 = vadd.xlane.f32.xlu1 %v434_v50  ;;  %v915_v50 = vadd.s32 %v893_v34, %v529_v40 }
  0xde   : > { %426 = vadd.xlane.f32.xlu0 %v425_v52 }
  0xdf   : > { %vm546_vm14 = vcmp.lt.s32.totalorder %v915_v50, 200 }
  0xe2   : > { %432 = vadd.xlane.f32.xlu0 %v431_v54  ;;  %v531_v54 = vadd.s32 32, %v881_v21 }
 0x13a   : > { %v295_v55 = vpop.xlane.xlu1 %294 }
 0x13e   : > { %v304_v56 = vpop.xlane.xlu1 %303 }
 0x13f   : > { %v298_v57 = vpop.xlane.xlu0 %297  ;;  %717 = vrcp.f32 %v304_v56 }
 0x140   : > { %719 = vrcp.f32 %v298_v57 }
 0x141   : > { %721 = vrcp.f32 %v295_v55 }
 0x142   : > { %v310_v58 = vpop.xlane.xlu1 %309 }
 0x143   : > { %v301_v59 = vpop.xlane.xlu0 %300  ;;  %723 = vrcp.f32 %v310_v58 }
 0x144   : > { %725 = vrcp.f32 %v301_v59  ;;  %v924_v59 = vadd.s32 %v893_v34, %v532_v48 }
 0x146   : > { %v316_v60 = vpop.xlane.xlu1 %315  ;;  %vm549_vm15 = vcmp.lt.s32.totalorder %v924_v59, 200 }
 0x147   : > { %v307_v61 = vpop.xlane.xlu0 %306  ;;  %727 = vrcp.f32 %v316_v60 }
 0x148   : > { %729 = vrcp.f32 %v307_v61 }
 0x14a   : > { %v380_v62 = vpop.xlane.xlu1 %379 }
 0x14b   : > { %v313_v63 = vpop.xlane.xlu0 %312 }
 0x14c   : > { %v718_v0 = vpop.eup %717  ;;  %731 = vrcp.f32 %v313_v63 }
 0x14d   : > { %v720_v1 = vpop.eup %719 }
 0x14e   : > { %v722_v2 = vpop.eup %721  ;;  %v440_v3 = vmul.f32 %v720_v1, %v380_v62  ;;  %v386_v4 = vpop.xlane.xlu1 %385 }
 0x14f   : > { %v377_v5 = vpop.xlane.xlu0 %376  ;;  %v444_v6 = vmul.f32 %v718_v0, %v386_v4 }
 0x150   : > { %v438_v7 = vmul.f32 %v722_v2, %v377_v5  ;;  %v724_v8 = vpop.eup %723  ;;  %v454_v9 = vmax.f32 %v440_v3, 1e-07  ;;  %v534_v2 = vadd.s32 56, %v881_v21 }
 0x151   : > { %v456_v10 = vmax.f32 %v444_v6, 1e-07  ;;  %v726_v12 = vpop.eup %725 }
 0x152   : > { %v453_v11 = vmax.f32 %v438_v7, 1e-07  ;;  %v873_v13 = vmin.f32 %v454_v9, 0.9999999  ;;  %v392_v14 = vpop.xlane.xlu1 %391  ;;  %v540_v9 = vadd.s32 %v893_v34, %v531_v54 }
 0x153   : > { %v383_v15 = vpop.xlane.xlu0 %382  ;;  %v875_v16 = vmin.f32 %v456_v10, 0.9999999  ;;  %v448_v18 = vmul.f32 %v724_v8, %v392_v14  ;;  %v533_v10 = vadd.s32 48, %v881_v21  ;;  %v543_v21 = vadd.s32 %v893_v34, %v534_v2 }
 0x154   : > { %v877_v17 = vmin.f32 %v453_v11, 0.9999999  ;;  %v442_v19 = vmul.f32 %v726_v12, %v383_v15  ;;  %v728_v20 = vpop.eup %727  ;;  %733 = vlog2.f32 %v873_v13  ;;  %v502_v52 = vsub.f32 1.0, %v873_v13 }
 0x155   : > { %735 = vlog2.f32 %v875_v16  ;;  %v458_v22 = vmax.f32 %v448_v18, 1e-07  ;;  %v730_v26 = vpop.eup %729  ;;  %v504_v62 = vsub.f32 1.0, %v875_v16  ;;  %vm548_vm0 = vcmp.lt.s32.totalorder %v540_v9, 200 }
 0x156   : > { %737 = vlog2.f32 %v877_v17  ;;  %v455_v23 = vmax.f32 %v442_v19, 1e-07  ;;  %v398_v24 = vpop.xlane.xlu1 %397  ;;  %v501_v56 = vsub.f32 1.0, %v877_v17  ;;  %v510_v3 = vmul.f32 %v502_v52, %v502_v52 }
 0x157   : > { %v389_v25 = vpop.xlane.xlu0 %388  ;;  %v885_v27 = vmin.f32 %v458_v22, 0.9999999  ;;  %v452_v28 = vmul.f32 %v728_v20, %v398_v24  ;;  %v512_v18 = vmul.f32 %v504_v62, %v504_v62  ;;  %vm551_vm2 = vcmp.lt.s32.totalorder %v543_v21, 200 }
 0x158   : > { %v888_v29 = vmin.f32 %v455_v23, 0.9999999  ;;  %v446_v30 = vmul.f32 %v730_v26, %v389_v25  ;;  %v509_v12 = vmul.f32 %v501_v56, %v501_v56 }
 0x159   : > { %739 = vlog2.f32 %v885_v27  ;;  %v460_v51 = vmax.f32 %v452_v28, 1e-07  ;;  %v732_v32 = vpop.eup %731  ;;  %v506_v7 = vsub.f32 1.0, %v885_v27 }
 0x15a   : > { %741 = vlog2.f32 %v888_v29  ;;  %v457_v33 = vmax.f32 %v446_v30, 1e-07  ;;  %v418_v35 = vpop.xlane.xlu1 %417  ;;  %v503_v13 = vsub.f32 1.0, %v888_v29  ;;  %v542_v30 = vadd.s32 %v893_v34, %v533_v10 }
 0x15b   : > { %v395_v36 = vpop.xlane.xlu0 %394  ;;  %v896_v38 = vmin.f32 %v460_v51, 0.9999999  ;;  %v470_v57 = vsub.f32 0.0, %v418_v35  ;;  %v514_v26 = vmul.f32 %v506_v7, %v506_v7 }
 0x15c   : > { %v450_v39 = vmul.f32 %v732_v32, %v395_v36  ;;  %v899_v41 = vmin.f32 %v457_v33, 0.9999999  ;;  %v511_v31 = vmul.f32 %v503_v13, %v503_v13  ;;  %vm550_vm1 = vcmp.lt.s32.totalorder %v542_v30, 200 }
 0x15d   : > { %743 = vlog2.f32 %v896_v38  ;;  %v508_v37 = vsub.f32 1.0, %v896_v38 }
 0x15e   : > { %v459_v43 = vmax.f32 %v450_v39, 1e-07  ;;  %745 = vlog2.f32 %v899_v41  ;;  %v424_v46 = vpop.xlane.xlu1 %423  ;;  %v505_v19 = vsub.f32 1.0, %v899_v41 }
 0x15f   : > { %v415_v47 = vpop.xlane.xlu0 %414  ;;  %v472_v0 = vsub.f32 0.0, %v424_v46  ;;  %v516_v62 = vmul.f32 %v508_v37, %v508_v37 }
 0x160   : > { %v912_v49 = vmin.f32 %v459_v43, 0.9999999  ;;  %v469_v6 = vsub.f32 0.0, %v415_v47  ;;  %v513_v39 = vmul.f32 %v505_v19, %v505_v19 }
 0x161   : > { %v734_v53 = vpop.eup %733 }
 0x162   : > { %747 = vlog2.f32 %v912_v49  ;;  %v736_v55 = vpop.eup %735  ;;  %v480_v58 = vmul.f32 0.6931472, %v734_v53  ;;  %v430_v1 = vpop.xlane.xlu1 %429  ;;  %v507_v42 = vsub.f32 1.0, %v912_v49 }
 0x163   : > { %v421_v60 = vpop.xlane.xlu0 %420  ;;  %v738_v61 = vpop.eup %737  ;;  %v484_v63 = vmul.f32 0.6931472, %v736_v55  ;;  %v474_v22 = vsub.f32 0.0, %v430_v1 }
 0x164   : > { %v494_v4 = vmul.f32 %v480_v58, %v470_v57  ;;  %v478_v5 = vmul.f32 0.6931472, %v738_v61  ;;  %v471_v25 = vsub.f32 0.0, %v421_v60  ;;  %v515_v49 = vmul.f32 %v507_v42, %v507_v42 }
 0x165   : > { %v496_v8 = vmul.f32 %v484_v63, %v472_v0 }
 0x166   : > { %v740_v11 = vpop.eup %739  ;;  %v518_v14 = vmul.f32 %v510_v3, %v494_v4  ;;  %v493_v15 = vmul.f32 %v478_v5, %v469_v6  ;;  %v436_v29 = vpop.xlane.xlu1 %435 }
 0x167   : > { %v427_v16 = vpop.xlane.xlu0 %426  ;;  %v742_v17 = vpop.eup %741  ;;  %v488_v20 = vmul.f32 0.6931472, %v740_v11  ;;  %v520_v27 = vmul.f32 %v512_v18, %v496_v8  ;;  %v476_v46 = vsub.f32 0.0, %v436_v29 }
 0x168   : > { %v517_v23 = vmul.f32 %v509_v12, %v493_v15  ;;  %v482_v24 = vmul.f32 0.6931472, %v742_v17  ;;  %v553_v32 = vsel %vm545_vm10, %v518_v14, 0.0  ;;  %v473_v48 = vsub.f32 0.0, %v427_v16 }
 0x169   : > { %v498_v28 = vmul.f32 %v488_v20, %v474_v22  ;;  %v563_v52 = vsel %vm561_vm12, %v553_v32, 0.0  ;;  %v555_v44 = vsel %vm547_vm13, %v520_v27, 0.0 }
 0x16a   : > { %v744_v51 = vpop.eup %743  ;;  %v552_v33 = vsel %vm544_vm11, %v517_v23, 0.0  ;;  %v495_v35 = vmul.f32 %v482_v24, %v471_v25  ;;  %v567_v45 = vsel %vm561_vm12, %v555_v44, 0.0  ;;  %v560_v23 = vld [vmem:[#allocation2] sm:$0x1] }
 0x16b   : > { %v746_v36 = vpop.eup %745  ;;  %v562_v40 = vsel %vm561_vm12, %v552_v33, 0.0  ;;  %v492_v41 = vmul.f32 0.6931472, %v744_v51  ;;  %v433_v34 = vpop.xlane.xlu0 %432  ;;  %v522_v53 = vmul.f32 %v514_v26, %v498_v28 }
 0x16c   : > { %v519_v43 = vmul.f32 %v511_v31, %v495_v35  ;;  %v486_v47 = vmul.f32 0.6931472, %v746_v36  ;;  %v564_v55 = vadd.f32 %v563_v52, %v562_v40  ;;  %v475_v61 = vsub.f32 0.0, %v433_v34 }
 0x16d   : > { %v500_v56 = vmul.f32 %v492_v41, %v476_v46  ;;  %v557_v2 = vsel %vm549_vm15, %v522_v53, 0.0 }
 0x16e   : > { %v554_v38 = vsel %vm546_vm14, %v519_v43, 0.0  ;;  %v497_v57 = vmul.f32 %v486_v47, %v473_v48  ;;  %v571_v9 = vsel %vm561_vm12, %v557_v2, 0.0 }
 0x16f   : > { %v748_v54 = vpop.eup %747  ;;  %v565_v58 = vsel %vm561_vm12, %v554_v38, 0.0  ;;  %v524_v50 = vmul.f32 %v516_v62, %v500_v56 }
 0x170   : > { %v490_v60 = vmul.f32 0.6931472, %v748_v54  ;;  %v566_v63 = vadd.f32 %v565_v58, %v564_v55  ;;  %v521_v0 = vmul.f32 %v513_v39, %v497_v57 }
 0x171   : > { %v559_v10 = vsel %vm551_vm2, %v524_v50, 0.0 }
 0x172   : > { %v499_v1 = vmul.f32 %v490_v60, %v475_v61  ;;  %v556_v3 = vsel %vm548_vm0, %v521_v0, 0.0  ;;  %v568_v4 = vadd.f32 %v567_v45, %v566_v63  ;;  %v575_v14 = vsel %vm561_vm12, %v559_v10, 0.0 }
 0x173   : > { %v569_v5 = vsel %vm561_vm12, %v556_v3, 0.0 }
 0x174   : > { %v523_v6 = vmul.f32 %v515_v49, %v499_v1  ;;  %v570_v7 = vadd.f32 %v569_v5, %v568_v4 }
 0x176   : > { %v558_v8 = vsel %vm550_vm1, %v523_v6, 0.0  ;;  %v572_v11 = vadd.f32 %v571_v9, %v570_v7 }
 0x177   : > { %v573_v12 = vsel %vm561_vm12, %v558_v8, 0.0 }
 0x178   : > { %v574_v13 = vadd.f32 %v573_v12, %v572_v11 }
 0x17a   : > { %v576_v59 = vadd.f32 %v575_v14, %v574_v13 }
 0x17c   : > { %577 = vadd.xlane.f32.xlu0 %v576_v59 }
 0x205   : > { %v578_v15 = vpop.xlane.xlu0 %577 }
 0x206   : > { %v579_v16 = vrot.slane %v578_v15, 4 }
 0x208   : > { %v580_v17 = vadd.f32 %v579_v16, %v578_v15 }
 0x20a   : > { %v581_v18 = vrot.slane %v580_v17, 2 }
 0x20c   : > { %v582_v19 = vadd.f32 %v581_v18, %v580_v17 }
 0x20e   : > { %v583_v20 = vrot.slane %v582_v19, 1 }
 0x210   : > { %v584_v22 = vadd.f32 %v583_v20, %v582_v19 }
 0x212   : > { %679 = vpush %v584_v22 }
 0x243   : > { %s680_s25 = spop %679  ;;  %593 = sbr.rel (%p674_p5) target bundleno = 594 (0x252), region = 40 }
 0x244   : > { %v586_v24 = vstv %s680_s25 }
 0x245   : > { %v587_v25 = vadd.f32 %v586_v24, %v560_v23 }
 0x247   : > { %589 = vst.msk [vmem:[#allocation2] sm:$0x1] %vm588_vm3, %v587_v25 }
 0x24e   : > { %v594_v21 = vld [vmem:[#allocation2] sm:$0x1] }
 0x24f   : > { %v595_v26 = vmul.f32 0.005, %v594_v21 }
 0x251   : > { %596 = vst.msk [vmem:[#allocation3] sm:$0x1] %vm588_vm3, %v595_v26 }
 0x252 PF: > { %p685_p6 = scmp.eq.s32.totalorder %s815_s13, 3  ;;  %s788_s26 = smov [#allocation3]  }
 0x253   : > { %s604_s27 = sshll.u32 %s788_s26, 4  ;;  %s605_s27 = int_to_ptr.vmem [resolvable:$true] %s604_s27 }
 0x254   : > { %s749_s28 = scalar_lea.vmem %s605_s27, 16  ;;  %s755_s29 = scalar_lea.vmem %s605_s27, 32 }
 0x255   : > { %p750_p7 = scmp.ne.s32.totalorder %s605_s27, %s749_s28  ;;  %p756_p10 = scmp.lt.s32.totalorder %s605_s27, %s605_s27 }
 0x256   : > { %p757_p11 = scmp.lt.s32.totalorder %s755_s29, %s749_s28 }
 0x257   : > { %p751_p8 = pnand %p750_p7, %p685_p6 }
 0x258   : > { %p758_p12 = por %p757_p11, %p756_p10 }
 0x259   : > { %p752_p9 = pneg %p751_p8 }
 0x25b   : > { %p759_p13 = pnand %p758_p12, %p752_p9 }
 0x25d   : > { %762 = shalt.err (!%p759_p13)
}
 0x25e   : > { %682 = dma.vmem_to_hbm [thread:$0]  (%p685_p6), %s605_s27, 16, %s975_s3, [#allocation4]  }
 0x25f   : > { %778 = dma.done.wait (%p685_p6), [#allocation4], 16  }
 0x260   : > { %780 = vsyncadd (%p685_p6), [#allocation4], 4294967280 }
 0x261 PF: > { %s14_s12 = sadd.s32 1, %s783_s12  }
 0x262   : > { %p11_p0 = scmp.ge.s32.totalorder %s14_s12, 6  }
 0x264   :  { %13 = sbr.rel (!%p11_p0) target bundleno = 1 (0x1), region = 70 }
 0x269   :  { %617 = vsyncpa [#allocation4], 1 }
 0x26a   :  { %619 = vsyncpa [#allocation4 + $0x1], 1 }

</bundles_post_ra>
